<compile_context>
chip_gen: v7x
topology: tpu7x:2x2x1
jax: 0.10.0
libtpu: 0.0.40
codegen_flags: <defaults>
</compile_context>

<pallas_src>
import jax
import jax.numpy as jnp
from jax.experimental import pallas as pl
from jax.experimental.pallas import tpu as pltpu


def _round_up(v, m):
    return ((v + m - 1) // m) * m


# ---------------------------------------------------------------------------
# Pass 1: Z = relu(X @ W1 + b1) @ W2   (conv1 -> ReLU -> dropout(eval) -> conv2 linear part)
# Computed once for all nodes and written to HBM in bf16, so the pass-2 row-tile
# sweep never recomputes the MLP or re-reads X.
# ---------------------------------------------------------------------------
def mlp_kernel(x_ref, w1_ref, b1_ref, w2_ref, z_ref):
    h = jnp.dot(x_ref[...], w1_ref[...], preferred_element_type=jnp.float32)
    h = jnp.maximum(h + b1_ref[...], 0.0)
    # F.dropout(training=self.training): inference mode -> identity.
    # TODO(synk): training-mode dropout (pltpu.prng_random_bits mask) not wired in.
    z_ref[...] = jnp.dot(h.astype(jnp.bfloat16), w2_ref[...],
                         preferred_element_type=jnp.float32).astype(z_ref.dtype)


# ---------------------------------------------------------------------------
# Pass 2: out = A @ Z + b2  (GCNConv sum aggregation; add_self_loops=False, normalize=False)
# Grid = (row tiles, reduction tiles); reduction last ("arbitrary"), rows "parallel".
# Accumulates directly into the VMEM-resident f32 output block (no scratch).
# ---------------------------------------------------------------------------
def aggregate_kernel(adj_ref, z_ref, b2_ref, out_ref):
    k = pl.program_id(1)

    @pl.when(k == 0)
    def _():
        out_ref[...] = jnp.broadcast_to(b2_ref[...], out_ref.shape)

    out_ref[...] += jnp.dot(adj_ref[...], z_ref[...],
                            preferred_element_type=jnp.float32)


# ---------------------------------------------------------------------------
# One-time (per graph / per model) preprocessing, hoisted off the hot path.
# ---------------------------------------------------------------------------
def select_tiles(n):
    """Adjacency tiles: multiples of 128, capped at 2048 (fits v7x's 64 MiB/TC VMEM)."""
    t = min(2048, _round_up(n, 128))
    return t, t


def build_dense_adjacency(edge_index, num_nodes, *, tm, tk):
    """Padded bf16 dense adjacency, built directly at kernel layout (no f32 temp).

    A[dst, src] += 1 so that out[dst] = sum_src A[dst, src] * z[src] (PyG source->target).
    Padded rows/cols are zero, so padded nodes never contribute.
    # TODO(synk): block-sparse adjacency streaming for large sparse graphs
    # (PrefetchScalarGridSpec nonzero-block lists + pl.when tile skip).
    """
    n_rows_p = _round_up(num_nodes, tm)
    n_cols_p = _round_up(num_nodes, tk)
    src, dst = edge_index[0], edge_index[1]
    adj = jnp.zeros((n_rows_p, n_cols_p), dtype=jnp.bfloat16)
    # bf16 scatter-add: exact for edge multiplicities up to 256.
    adj = adj.at[dst, src].add(jnp.bfloat16(1.0))
    return adj


def pad_params(w1, b1, w2, b2):
    """Pad feature dims to lane multiples of 128 and cast weights to bf16, once."""
    in_feat, hid_feat = w1.shape
    out_feat = w2.shape[1]
    in_p, hid_p, out_p = (_round_up(d, 128) for d in (in_feat, hid_feat, out_feat))
    bf16, f32 = jnp.bfloat16, jnp.float32
    w1_p = jnp.zeros((in_p, hid_p), bf16).at[:in_feat, :hid_feat].set(w1.astype(bf16))
    w2_p = jnp.zeros((hid_p, out_p), bf16).at[:hid_feat, :out_feat].set(w2.astype(bf16))
    b1_p = jnp.zeros((1, hid_p), f32).at[:, :hid_feat].set(b1)
    b2_p = jnp.zeros((1, out_p), f32).at[:, :out_feat].set(b2)
    return w1_p, b1_p, w2_p, b2_p


# ---------------------------------------------------------------------------
# Forward
# ---------------------------------------------------------------------------
def topgcn_forward(x, adj_padded, w1_p, b1_p, w2_p, b2_p, *, tm, tk, out_feat,
                   vmem_limit_bytes=48 * 1024 * 1024):
    n, in_feat = x.shape
    in_p, hid_p = w1_p.shape
    out_p = w2_p.shape[1]
    n_rows_p, n_cols_p = adj_padded.shape

    # Pad node features (rows to the reduction padding, features to lanes), bf16 operands.
    x_p = jnp.zeros((n_cols_p, in_p), jnp.bfloat16).at[:n, :in_feat].set(
        x.astype(jnp.bfloat16))

    # ---- Pass 1: Z = relu(X @ W1 + b1) @ W2, computed once, stored bf16 in HBM. ----
    tz = tk
    gz = n_cols_p // tz
    z = pl.pallas_call(
        mlp_kernel,
        out_shape=jax.ShapeDtypeStruct((n_cols_p, out_p), jnp.bfloat16),
        grid_spec=pltpu.PrefetchScalarGridSpec(
            num_scalar_prefetch=0,
            grid=(gz,),
            in_specs=[
                pl.BlockSpec((tz, in_p), lambda i: (i, 0)),        # X row tile
                pl.BlockSpec((in_p, hid_p), lambda i: (0, 0)),     # W1 (resident)
                pl.BlockSpec((1, hid_p), lambda i: (0, 0)),        # b1 (resident)
                pl.BlockSpec((hid_p, out_p), lambda i: (0, 0)),    # W2 (resident)
            ],
            out_specs=pl.BlockSpec((tz, out_p), lambda i: (i, 0)),
        ),
        compiler_params=pltpu.CompilerParams(
            dimension_semantics=("parallel",),
            vmem_limit_bytes=vmem_limit_bytes,
        ),
        cost_estimate=pl.CostEstimate(
            flops=2 * n_cols_p * (in_p * hid_p + hid_p * out_p),
            transcendentals=0,
            bytes_accessed=(n_cols_p * in_p * 2 + in_p * hid_p * 2
                            + hid_p * out_p * 2 + (hid_p + out_p) * 4
                            + n_cols_p * out_p * 2)),
    )(x_p, w1_p, b1_p, w2_p)

    # ---- Pass 2: out = A @ Z + b2 (dense aggregation, reduction axis last). ----
    gm, gk = n_rows_p // tm, n_cols_p // tk
    flops = gm * gk * 2 * tm * tk * out_p
    bytes_accessed = (n_rows_p * n_cols_p * 2          # adjacency (bf16)
                      + gm * n_cols_p * out_p * 2      # Z streamed per row tile (bf16)
                      + out_p * 4                      # b2 (f32)
                      + n_rows_p * out_p * 4)          # output (f32)

    out_padded = pl.pallas_call(
        aggregate_kernel,
        out_shape=jax.ShapeDtypeStruct((n_rows_p, out_p), jnp.float32),
        grid_spec=pltpu.PrefetchScalarGridSpec(
            num_scalar_prefetch=0,
            grid=(gm, gk),
            in_specs=[
                pl.BlockSpec((tm, tk), lambda i, k: (i, k)),       # A tile
                pl.BlockSpec((tk, out_p), lambda i, k: (k, 0)),    # Z K-tile
                pl.BlockSpec((1, out_p), lambda i, k: (0, 0)),     # b2 (resident)
            ],
            out_specs=pl.BlockSpec((tm, out_p), lambda i, k: (i, 0)),
        ),
        compiler_params=pltpu.CompilerParams(
            dimension_semantics=("parallel", "arbitrary"),
            vmem_limit_bytes=vmem_limit_bytes,
        ),
        cost_estimate=pl.CostEstimate(
            flops=flops, transcendentals=0, bytes_accessed=bytes_accessed),
    )(adj_padded, z, b2_p)

    return out_padded[:n, :out_feat]


if __name__ == "__main__":
    # Small shapes consistent with the module's forward.
    N = 16          # number of graph nodes
    IN_FEAT = 8
    HID_FEAT = 32
    OUT_FEAT = 16
    E = 48          # number of edges

    key = jax.random.PRNGKey(0)
    kx, ke1, ke2, kw1, kb1, kw2, kb2 = jax.random.split(key, 7)

    # Node features and edge index (PyG convention: row 0 = source, row 1 = target).
    x = jax.random.normal(kx, (N, IN_FEAT), dtype=jnp.float32)
    src = jax.random.randint(ke1, (E,), 0, N, dtype=jnp.int32)
    dst = jax.random.randint(ke2, (E,), 0, N, dtype=jnp.int32)
    edge_index = jnp.stack([src, dst], axis=0)          # (2, E)

    # Deterministic parameter init (shapes from TopGCN.__init__).
    # conv1 = nn.Linear(in_feat, hid_feat)  -> stored transposed as (in, hid) for x @ W.
    w1 = 0.1 * jax.random.normal(kw1, (IN_FEAT, HID_FEAT), dtype=jnp.float32)
    b1 = 0.1 * jax.random.normal(kb1, (1, HID_FEAT), dtype=jnp.float32)
    # conv2 = GCNConv(hid_feat, out_feat) -> lin weight (out, hid) stored as (hid, out).
    w2 = 0.1 * jax.random.normal(kw2, (HID_FEAT, OUT_FEAT), dtype=jnp.float32)
    b2 = 0.1 * jax.random.normal(kb2, (1, OUT_FEAT), dtype=jnp.float32)

    # One-time preprocessing (hoisted off the per-forward hot path).
    tm, tk = select_tiles(N)
    adj = build_dense_adjacency(edge_index, N, tm=tm, tk=tk)
    w1_p, b1_p, w2_p, b2_p = pad_params(w1, b1, w2, b2)

    out = topgcn_forward(x, adj, w1_p, b1_p, w2_p, b2_p,
                         tm=tm, tk=tk, out_feat=OUT_FEAT)
    out = jax.block_until_ready(out)

    # Pure-JAX reference mirroring the kernel's bf16 operand quantization
    # (f32 accumulation everywhere; GCNConv with add_self_loops=False, normalize=False).
    q = lambda a: a.astype(jnp.bfloat16).astype(jnp.float32)
    adj_ref = jnp.zeros((N, N), jnp.float32).at[dst, src].add(1.0)
    h_ref = jnp.maximum(q(x) @ q(w1) + b1, 0.0)
    z_ref = q(h_ref) @ q(w2)
    ref = q(adj_ref) @ q(z_ref) + b2

    assert out.shape == (N, OUT_FEAT)
    assert jnp.allclose(out, ref, atol=1e-2, rtol=1e-2)

    print("KERNEL_OK")
</pallas_src>

<mosaic_0001>
module attributes {stable_mosaic.version = 11 : i64} {
  func.func @mlp_kernel(%arg0: i32, %arg1: memref<128x128xbf16, #tpu.memory_space<vmem>>, %arg2: memref<128x128xbf16, #tpu.memory_space<vmem>>, %arg3: memref<1x128xf32, #tpu.memory_space<vmem>>, %arg4: memref<128x128xbf16, #tpu.memory_space<vmem>>, %arg5: memref<128x128xbf16, #tpu.memory_space<vmem>>) attributes {dimension_semantics = [#tpu.dimension_semantics<parallel>], iteration_bounds = array<i64: 1>, scalar_prefetch = 0 : i64, scratch_operands = 0 : i64, tpu.core_type = #tpu.core_type<tc>, window_params = [{transform_indices = @transform_0, window_bounds = array<i64: 128, 128>}, {pipeline_mode = #tpu.pipeline_mode<synchronous>, transform_indices = @transform_1, window_bounds = array<i64: 128, 128>}, {pipeline_mode = #tpu.pipeline_mode<synchronous>, transform_indices = @transform_2, window_bounds = array<i64: 1, 128>}, {pipeline_mode = #tpu.pipeline_mode<synchronous>, transform_indices = @transform_3, window_bounds = array<i64: 128, 128>}, {transform_indices = @transform_4, window_bounds = array<i64: 128, 128>}]} {
    %c0 = arith.constant 0 : index
    %c0_0 = arith.constant 0 : index
    %0 = vector.load %arg1[%c0, %c0_0] : memref<128x128xbf16, #tpu.memory_space<vmem>>, vector<128x128xbf16>
    %c0_1 = arith.constant 0 : index
    %c0_2 = arith.constant 0 : index
    %1 = vector.load %arg2[%c0_1, %c0_2] : memref<128x128xbf16, #tpu.memory_space<vmem>>, vector<128x128xbf16>
    %cst = arith.constant dense<0.000000e+00> : vector<128x128xf32>
    %2 = tpu.matmul %0, %1, %cst {dimension_numbers = #tpu.dot_dimension_numbers<[1], [0], [0], [1], [0, 0, 1, 1], [], []>} : vector<128x128xbf16>, vector<128x128xbf16>, vector<128x128xf32> -> vector<128x128xf32>
    %c0_3 = arith.constant 0 : index
    %c0_4 = arith.constant 0 : index
    %3 = vector.load %arg3[%c0_3, %c0_4] : memref<1x128xf32, #tpu.memory_space<vmem>>, vector<1x128xf32>
    %4 = vector.broadcast %3 : vector<1x128xf32> to vector<128x128xf32>
    %5 = arith.addf %2, %4 : vector<128x128xf32>
    %cst_5 = arith.constant 0.000000e+00 : f32
    %6 = vector.broadcast %cst_5 : f32 to vector<128x128xf32>
    %7 = arith.maximumf %5, %6 : vector<128x128xf32>
    %8 = arith.truncf %7 : vector<128x128xf32> to vector<128x128xbf16>
    %c0_6 = arith.constant 0 : index
    %c0_7 = arith.constant 0 : index
    %9 = vector.load %arg4[%c0_6, %c0_7] : memref<128x128xbf16, #tpu.memory_space<vmem>>, vector<128x128xbf16>
    %cst_8 = arith.constant dense<0.000000e+00> : vector<128x128xf32>
    %10 = tpu.matmul %8, %9, %cst_8 {dimension_numbers = #tpu.dot_dimension_numbers<[1], [0], [0], [1], [0, 0, 1, 1], [], []>} : vector<128x128xbf16>, vector<128x128xbf16>, vector<128x128xf32> -> vector<128x128xf32>
    %11 = arith.truncf %10 : vector<128x128xf32> to vector<128x128xbf16>
    %c0_9 = arith.constant 0 : index
    %c0_10 = arith.constant 0 : index
    %12 = vector.load %arg5[%c0_9, %c0_10] : memref<128x128xbf16, #tpu.memory_space<vmem>>, vector<128x128xbf16>
    tpu.vector_store %arg5[%c0_9, %c0_10], %11 {strides = array<i32>} : memref<128x128xbf16, #tpu.memory_space<vmem>>, vector<128x128xbf16>,
    return
  }
  func.func @transform_0(%arg0: i32) -> (i32, i32) {
    %c0_i32 = arith.constant 0 : i32
    %c0_i32_0 = arith.constant 0 : i32
    return %arg0, %c0_i32 : i32, i32
  }
  func.func @transform_1(%arg0: i32) -> (i32, i32) {
    %c0_i32 = arith.constant 0 : i32
    %c0_i32_0 = arith.constant 0 : i32
    %c0_i32_1 = arith.constant 0 : i32
    return %c0_i32, %c0_i32_0 : i32, i32
  }
  func.func @transform_2(%arg0: i32) -> (i32, i32) {
    %c0_i32 = arith.constant 0 : i32
    %c0_i32_0 = arith.constant 0 : i32
    %c0_i32_1 = arith.constant 0 : i32
    return %c0_i32, %c0_i32_0 : i32, i32
  }
  func.func @transform_3(%arg0: i32) -> (i32, i32) {
    %c0_i32 = arith.constant 0 : i32
    %c0_i32_0 = arith.constant 0 : i32
    %c0_i32_1 = arith.constant 0 : i32
    return %c0_i32, %c0_i32_0 : i32, i32
  }
  func.func @transform_4(%arg0: i32) -> (i32, i32) {
    %c0_i32 = arith.constant 0 : i32
    %c0_i32_0 = arith.constant 0 : i32
    return %arg0, %c0_i32 : i32, i32
  }
}

</mosaic_0001>

<bundles_post_ra>
// kernel: tpu_custom_call.1
= control target key start
LH: loop header
LB: loop body
LE: loop exit
PB: predicated region body
PF: predicated region fallthrough
CT: control target
= control target key end

     0   :  { %9 = vsyncpa [#allocation3], 0  ;;  %s1000_s0 = inlined_call_operand.hbm [shape: bf16[128,128], index: 0, kind: input, shape index: {}]   ;;  %s1001_s1 = inlined_call_operand.hbm [shape: bf16[128,128], index: 1, kind: input, shape index: {}]   ;;  %s1002_s2 = inlined_call_operand.vmem [shape: f32[1,128], index: 2, kind: input, shape index: {}]   ;;  %s1003_s3 = inlined_call_operand.hbm [shape: bf16[128,128], index: 3, kind: input, shape index: {}]   ;;  %s1004_s4 = inlined_call_operand.hbm [shape: bf16[128,128], index: 4, kind: output, shape index: {}]  }
   0x1   :  { %10 = vsyncpa [#allocation6], 0 }
   0x2   :  { %11 = vsyncpa [#allocation4], 0  ;;  %s899_s15 = smov [#allocation5]   ;;  %s900_s17 = smov [#allocation2]  }
   0x3   :  { %s29_s16 = sshll.u32 %s899_s15, 4  ;;  %s17_s18 = sshll.u32 %s900_s17, 4  ;;  %s30_s16 = int_to_ptr.vmem [resolvable:$true] %s29_s16  ;;  %s930_s18 = int_to_ptr.vmem [resolvable:$true] %s17_s18 }
   0x4   :  { %s805_s21 = scalar_lea.hbm %s1001_s1, 1024 }
   0x5   :  { %p806_p0 = scmp.ne.s32.totalorder %s1001_s1, %s805_s21  ;;  %p809_p1 = scmp.lt.u32.totalorder %s805_s21, %s1001_s1 }
   0x7   :  { %p811_p2 = pnand %p809_p1, %p806_p0 }
   0x9   :  { %814 = shalt.err (!%p811_p2)
}
   0xa   :  { %s815_s26 = scalar_lea.vmem %s30_s16, 1024  ;;  %p820_p4 = scmp.lt.s32.totalorder %s30_s16, %s30_s16 }
   0xb   :  { %p816_p3 = scmp.ne.s32.totalorder %s30_s16, %s815_s26  ;;  %p821_p5 = scmp.lt.s32.totalorder %s815_s26, %s815_s26 }
   0xd   :  { %p822_p6 = por %p821_p5, %p820_p4 }
   0xf   :  { %p823_p7 = pnand %p822_p6, %p816_p3 }
  0x11   :  { %826 = shalt.err (!%p823_p7)
}
  0x12   :  { %s901_s27 = smov 64   ;;  %s902_s28 = smov 4  }
  0x13   :  { %35 = dma.hbm_to_vmem [thread:$0]  %s1001_s1, 1024, %s30_s16, [#allocation6], %s901_s27, %s901_s27, %s902_s28  }
  0x14   :  { %s827_s7 = scalar_lea.hbm %s1000_s0, 1024 }
  0x15   :  { %p828_p8 = scmp.ne.s32.totalorder %s1000_s0, %s827_s7  ;;  %p831_p9 = scmp.lt.u32.totalorder %s827_s7, %s1000_s0 }
  0x17   :  { %p833_p10 = pnand %p831_p9, %p828_p8 }
  0x19   :  { %836 = shalt.err (!%p833_p10)
}
  0x1a   :  { %s837_s12 = scalar_lea.vmem %s930_s18, 1024  ;;  %p842_p12 = scmp.lt.s32.totalorder %s930_s18, %s930_s18 }
  0x1b   :  { %p838_p11 = scmp.ne.s32.totalorder %s930_s18, %s837_s12  ;;  %p843_p13 = scmp.lt.s32.totalorder %s837_s12, %s837_s12 }
  0x1d   :  { %p844_p0 = por %p843_p13, %p842_p12 }
  0x1f   :  { %p845_p1 = pnand %p844_p0, %p838_p11 }
  0x21   :  { %848 = shalt.err (!%p845_p1)
}
  0x22   :  { %23 = dma.hbm_to_vmem [thread:$0]  %s1000_s0, 1024, %s930_s18, [#allocation3], %s901_s27, %s901_s27, %s902_s28  }
  0x23   :  { %s903_s14 = smov [#allocation7]   ;;  %s849_s19 = scalar_lea.hbm %s1003_s3, 1024 }
  0x24   :  { %s43_s15 = sshll.u32 %s903_s14, 4  ;;  %p850_p2 = scmp.ne.s32.totalorder %s1003_s3, %s849_s19  ;;  %s44_s15 = int_to_ptr.vmem [resolvable:$true] %s43_s15 }
  0x25   :  { %p853_p3 = scmp.lt.u32.totalorder %s849_s19, %s1003_s3 }
  0x27   :  { %p855_p4 = pnand %p853_p3, %p850_p2 }
  0x29   :  { %858 = shalt.err (!%p855_p4)
}
  0x2a   :  { %s859_s24 = scalar_lea.vmem %s44_s15, 1024  ;;  %p864_p6 = scmp.lt.s32.totalorder %s44_s15, %s44_s15 }
  0x2b   :  { %p860_p5 = scmp.ne.s32.totalorder %s44_s15, %s859_s24  ;;  %p865_p7 = scmp.lt.s32.totalorder %s859_s24, %s859_s24 }
  0x2d   :  { %p866_p8 = por %p865_p7, %p864_p6 }
  0x2f   :  { %p867_p9 = pnand %p866_p8, %p860_p5 }
  0x31   :  { %870 = shalt.err (!%p867_p9)
}
  0x32   :  { %49 = dma.hbm_to_vmem [thread:$0]  %s1003_s3, 1024, %s44_s15, [#allocation6], %s901_s27, %s901_s27, %s902_s28  }
  0x33   :  { %893 = dma.done.wait [#allocation3], 1024  }
  0x34   :  { %894 = vsyncadd [#allocation3], 4294966272 }
  0x35   :  { %895 = dma.done.wait [#allocation6], 2048  }
  0x36   :  { %896 = vsyncadd [#allocation6], 4294965248  ;;  %v781_v0 = vld [vmem:[#allocation5] sm:$0xff]   ;;  %v782_v1 = vld [vmem:[#allocation5 + $0x8] sm:$0xff]  }
  0x37   :  { %711 = vmatprep.subr.bf16.mxu0 %v781_v0  ;;  %v783_v2 = vld [vmem:[#allocation5 + $0x10] sm:$0xff]   ;;  %v784_v3 = vld [vmem:[#allocation5 + $0x18] sm:$0xff]   ;;  %v789_v4 = vld [vmem:[#allocation2] sm:$0xff]  }
  0x38   :  { %712 = vmatpush3.bf16.msra.mxu0 %v781_v0  ;;  %727 = vmatprep.mubr.bf16.mxu0 %v789_v4  ;;  %v785_v5 = vld [vmem:[#allocation5 + $0x20] sm:$0xff]   ;;  %v786_v6 = vld [vmem:[#allocation5 + $0x28] sm:$0xff]   ;;  %v787_v9 = vld [vmem:[#allocation5 + $0x30] sm:$0xff]  }
  0x39   :  { %713 = vmatprep.subr.bf16.mxu0 %v782_v1  ;;  %v797_v7 = vld [vmem:[#allocation7] sm:$0xff]   ;;  %v798_v8 = vld [vmem:[#allocation7 + $0x8] sm:$0xff]   ;;  %v799_v10 = vld [vmem:[#allocation7 + $0x10] sm:$0xff]  }
  0x3a   :  { %743 = vmatprep.subr.bf16.mxu1 %v797_v7  ;;  %v788_v11 = vld [vmem:[#allocation5 + $0x38] sm:$0xff]   ;;  %v801_v13 = vld [vmem:[#allocation7 + $0x20] sm:$0xff]   ;;  %v790_v14 = vld [vmem:[#allocation2 + $0x8] sm:$0xff]  }
  0x3b   :  { %744 = vmatpush3.bf16.msra.mxu1 %v797_v7  ;;  %v800_v12 = vld [vmem:[#allocation7 + $0x18] sm:$0xff]   ;;  %v791_v15 = vld [vmem:[#allocation2 + $0x10] sm:$0xff]   ;;  %v802_v16 = vld [vmem:[#allocation7 + $0x28] sm:$0xff]  }
  0x3c   :  { %714 = vmatpush3.bf16.msra.mxu0 %v782_v1  ;;  %745 = vmatprep.subr.bf16.mxu1 %v798_v8  ;;  %v792_v17 = vld [vmem:[#allocation2 + $0x18] sm:$0xff]   ;;  %v793_v18 = vld [vmem:[#allocation2 + $0x20] sm:$0xff]   ;;  %v794_v19 = vld [vmem:[#allocation2 + $0x28] sm:$0xff]  }
  0x3d   :  { %715 = vmatprep.subr.bf16.mxu0 %v783_v2  ;;  %v795_v20 = vld [vmem:[#allocation2 + $0x30] sm:$0xff]   ;;  %v796_v21 = vld [vmem:[#allocation2 + $0x38] sm:$0xff]   ;;  %v575_v24 = vld [vmem:[%s1002_s2] ss:$0 sm:$0xff]  ;;  %s904_s2 = smov [#allocation8]  }
  0x3e   :  { %v803_v22 = vld [vmem:[#allocation7 + $0x30] sm:$0xff]   ;;  %v804_v23 = vld [vmem:[#allocation7 + $0x38] sm:$0xff]   ;;  %s562_s26 = sshll.u32 %s904_s2, 4  ;;  %s563_s26 = int_to_ptr.vmem [resolvable:$true] %s562_s26 }
  0x3f   :  { %746 = vmatpush3.bf16.msra.mxu1 %v798_v8  ;;  %s871_s29 = scalar_lea.vmem %s563_s26, 1024  ;;  %p876_p11 = scmp.lt.s32.totalorder %s563_s26, %s563_s26 }
  0x40   :  { %716 = vmatpush3.bf16.msra.mxu0 %v783_v2  ;;  %747 = vmatprep.subr.bf16.mxu1 %v799_v10  ;;  %p872_p10 = scmp.ne.s32.totalorder %s563_s26, %s871_s29  ;;  %p877_p12 = scmp.lt.s32.totalorder %s871_s29, %s871_s29 }
  0x41   :  { %717 = vmatprep.subr.bf16.mxu0 %v784_v3 }
  0x42   :  { %p878_p13 = por %p877_p12, %p876_p11 }
  0x43   :  { %748 = vmatpush3.bf16.msra.mxu1 %v799_v10 }
  0x44   :  { %718 = vmatpush3.bf16.msra.mxu0 %v784_v3  ;;  %749 = vmatprep.subr.bf16.mxu1 %v800_v12  ;;  %p879_p0 = pnand %p878_p13, %p872_p10 }
  0x45   :  { %719 = vmatprep.subr.bf16.mxu0 %v785_v5 }
  0x47   :  { %750 = vmatpush3.bf16.msra.mxu1 %v800_v12 }
  0x48   :  { %720 = vmatpush3.bf16.msra.mxu0 %v785_v5  ;;  %751 = vmatprep.subr.bf16.mxu1 %v801_v13 }
  0x49   :  { %721 = vmatprep.subr.bf16.mxu0 %v786_v6 }
  0x4b   :  { %752 = vmatpush3.bf16.msra.mxu1 %v801_v13 }
  0x4c   :  { %722 = vmatpush3.bf16.msra.mxu0 %v786_v6  ;;  %753 = vmatprep.subr.bf16.mxu1 %v802_v16 }
  0x4d   :  { %723 = vmatprep.subr.bf16.mxu0 %v787_v9 }
  0x4f   :  { %754 = vmatpush3.bf16.msra.mxu1 %v802_v16 }
  0x50   :  { %724 = vmatpush3.bf16.msra.mxu0 %v787_v9  ;;  %755 = vmatprep.subr.bf16.mxu1 %v803_v22 }
  0x51   :  { %725 = vmatprep.subr.bf16.mxu0 %v788_v11 }
  0x53   :  { %756 = vmatpush3.bf16.msra.mxu1 %v803_v22 }
  0x54   :  { %726 = vmatpush3.bf16.msra.mxu0 %v788_v11  ;;  %757 = vmatprep.subr.bf16.mxu1 %v804_v23 }
  0x57   :  { %728 = vmatmul.mubr.bf16.vlgmr.msra.gmra.mrb[0].mxu0 %v790_v14  ;;  %758 = vmatpush3.bf16.msra.mxu1 %v804_v23 }
  0x58   :  { %731 = vmatprep.mubr.bf16.mxu0 %v791_v15 }
  0x5f   :  { %732 = vmatmul.mubr.bf16.gmra.mrb[4].mxu0 %v792_v17 }
  0x60   :  { %735 = vmatprep.mubr.bf16.mxu0 %v793_v18 }
  0x67   :  { %736 = vmatmul.mubr.bf16.gmra.mrb[8].mxu0 %v794_v19 }
  0x68   :  { %739 = vmatprep.mubr.bf16.mxu0 %v795_v20 }
  0x6f   :  { %740 = vmatmul.mubr.bf16.gmra.mrb[12].mxu0 %v796_v21 }
 0x12a   :  { %v729_v25 = vpop.f32.mrb[0].mxu0 }
 0x12b   :  { %v238_v26 = vadd.f32 %v729_v25, %v575_v24  ;;  %v229_v27 = vpop.f32.mrb[1].mxu0 }
 0x12c   :  { %v230_v28 = vadd.f32 %v575_v24, %v229_v27  ;;  %v730_v29 = vpop.f32.mrb[2].mxu0 }
 0x12d   :  { %v241_v30 = vadd.f32 %v730_v29, %v575_v24  ;;  %v232_v31 = vpop.f32.mrb[3].mxu0  ;;  %v294_v33 = vmax.f32 %v238_v26, 0.0 }
 0x12e   :  { %v233_v32 = vadd.f32 %v575_v24, %v232_v31  ;;  %v292_v35 = vmax.f32 %v230_v28, 0.0 }
 0x12f   :  { %v295_v34 = vmax.f32 %v241_v30, 0.0 }
 0x130   :  { %v293_v36 = vmax.f32 %v233_v32, 0.0 }
 0x131   :  { %v309_v37 = vpack.c.bf16 %v295_v34, %v294_v33 }
 0x132   :  { %v733_v38 = vpop.f32.mrb[4].mxu0  ;;  %v308_v39 = vpack.c.bf16 %v293_v36, %v292_v35 }
 0x133   :  { %v254_v40 = vadd.f32 %v733_v38, %v575_v24  ;;  %v245_v41 = vpop.f32.mrb[5].mxu0 }
 0x134   :  { %v246_v42 = vadd.f32 %v575_v24, %v245_v41  ;;  %v734_v43 = vpop.f32.mrb[6].mxu0  ;;  %759 = vmatprep.mubr.bf16.mxu1 %v308_v39 }
 0x135   :  { %v257_v44 = vadd.f32 %v734_v43, %v575_v24  ;;  %v248_v45 = vpop.f32.mrb[7].mxu0  ;;  %760 = vmatmul.mubr.bf16.vlgmr.msra.gmra.mrb[0].mxu1 %v309_v37  ;;  %v298_v47 = vmax.f32 %v254_v40, 0.0 }
 0x136   :  { %v249_v46 = vadd.f32 %v575_v24, %v248_v45  ;;  %v296_v49 = vmax.f32 %v246_v42, 0.0 }
 0x137   :  { %v299_v48 = vmax.f32 %v257_v44, 0.0 }
 0x138   :  { %v297_v50 = vmax.f32 %v249_v46, 0.0 }
 0x139   :  { %v311_v51 = vpack.c.bf16 %v299_v48, %v298_v47 }
 0x13a   :  { %v310_v52 = vpack.c.bf16 %v297_v50, %v296_v49  ;;  %v737_v53 = vpop.f32.mrb[8].mxu0 }
 0x13b   :  { %v270_v54 = vadd.f32 %v737_v53, %v575_v24  ;;  %v261_v55 = vpop.f32.mrb[9].mxu0 }
 0x13c   :  { %v262_v56 = vadd.f32 %v575_v24, %v261_v55  ;;  %v738_v57 = vpop.f32.mrb[10].mxu0  ;;  %763 = vmatprep.mubr.bf16.mxu1 %v310_v52 }
 0x13d   :  { %v273_v58 = vadd.f32 %v738_v57, %v575_v24  ;;  %v264_v59 = vpop.f32.mrb[11].mxu0  ;;  %764 = vmatmul.mubr.bf16.gmra.mrb[4].mxu1 %v311_v51  ;;  %v302_v61 = vmax.f32 %v270_v54, 0.0 }
 0x13e   :  { %v265_v60 = vadd.f32 %v575_v24, %v264_v59  ;;  %v300_v63 = vmax.f32 %v262_v56, 0.0 }
 0x13f   :  { %v303_v62 = vmax.f32 %v273_v58, 0.0 }
 0x140   :  { %v301_v0 = vmax.f32 %v265_v60, 0.0 }
 0x141   :  { %v313_v1 = vpack.c.bf16 %v303_v62, %v302_v61 }
 0x142   :  { %v312_v2 = vpack.c.bf16 %v301_v0, %v300_v63  ;;  %v741_v3 = vpop.f32.mrb[12].mxu0 }
 0x143   :  { %v286_v4 = vadd.f32 %v741_v3, %v575_v24  ;;  %v277_v5 = vpop.f32.mrb[13].mxu0 }
 0x144   :  { %v278_v6 = vadd.f32 %v575_v24, %v277_v5  ;;  %v742_v7 = vpop.f32.mrb[14].mxu0  ;;  %767 = vmatprep.mubr.bf16.mxu1 %v312_v2 }
 0x145   :  { %v289_v8 = vadd.f32 %v742_v7, %v575_v24  ;;  %v280_v9 = vpop.f32.mrb[15].mxu0  ;;  %768 = vmatmul.mubr.bf16.gmra.mrb[8].mxu1 %v313_v1  ;;  %v306_v11 = vmax.f32 %v286_v4, 0.0 }
 0x146   :  { %v281_v10 = vadd.f32 %v575_v24, %v280_v9  ;;  %v304_v13 = vmax.f32 %v278_v6, 0.0 }
 0x147   :  { %v307_v12 = vmax.f32 %v289_v8, 0.0 }
 0x148   :  { %v305_v14 = vmax.f32 %v281_v10, 0.0 }
 0x149   :  { %v315_v15 = vpack.c.bf16 %v307_v12, %v306_v11 }
 0x14a   :  { %v314_v16 = vpack.c.bf16 %v305_v14, %v304_v13 }
 0x14c   :  { %771 = vmatprep.mubr.bf16.mxu1 %v314_v16 }
 0x14d   :  { %772 = vmatmul.mubr.bf16.gmra.mrb[12].mxu1 %v315_v15 }
 0x208   :  { %v761_v17 = vpop.f32.mrb[0].mxu1 }
 0x209   :  { %v414_v18 = vpop.f32.mrb[1].mxu1 }
 0x20a   :  { %v762_v19 = vpop.f32.mrb[2].mxu1 }
 0x20b   :  { %v640_v20 = vpack.c.bf16 %v762_v19, %v761_v17  ;;  %v417_v21 = vpop.f32.mrb[3].mxu1 }
 0x20c   :  { %v635_v22 = vpack.c.bf16 %v417_v21, %v414_v18 }
 0x20d   :  { %672 = vst [vmem:[#allocation8 + $0x8] sm:$0xff] %v640_v20  }
 0x20e   :  { %636 = vst [vmem:[#allocation8] sm:$0xff] %v635_v22  }
 0x210   :  { %v765_v23 = vpop.f32.mrb[4].mxu1 }
 0x211   :  { %v430_v25 = vpop.f32.mrb[5].mxu1 }
 0x212   :  { %v766_v26 = vpop.f32.mrb[6].mxu1 }
 0x213   :  { %v650_v24 = vpack.c.bf16 %v766_v26, %v765_v23  ;;  %v433_v27 = vpop.f32.mrb[7].mxu1 }
 0x214   :  { %v645_v28 = vpack.c.bf16 %v433_v27, %v430_v25 }
 0x215   :  { %674 = vst [vmem:[#allocation8 + $0x18] sm:$0xff] %v650_v24  }
 0x216   :  { %673 = vst [vmem:[#allocation8 + $0x10] sm:$0xff] %v645_v28  }
 0x218   :  { %v769_v29 = vpop.f32.mrb[8].mxu1 }
 0x219   :  { %v446_v30 = vpop.f32.mrb[9].mxu1 }
 0x21a   :  { %v770_v31 = vpop.f32.mrb[10].mxu1 }
 0x21b   :  { %v660_v32 = vpack.c.bf16 %v770_v31, %v769_v29  ;;  %v449_v33 = vpop.f32.mrb[11].mxu1 }
 0x21c   :  { %v655_v34 = vpack.c.bf16 %v449_v33, %v446_v30 }
 0x21d   :  { %676 = vst [vmem:[#allocation8 + $0x28] sm:$0xff] %v660_v32  }
 0x21e   :  { %675 = vst [vmem:[#allocation8 + $0x20] sm:$0xff] %v655_v34  }
 0x220   :  { %v773_v35 = vpop.f32.mrb[12].mxu1 }
 0x221   :  { %v462_v36 = vpop.f32.mrb[13].mxu1 }
 0x222   :  { %v774_v37 = vpop.f32.mrb[14].mxu1 }
 0x223   :  { %v670_v38 = vpack.c.bf16 %v774_v37, %v773_v35  ;;  %v465_v39 = vpop.f32.mrb[15].mxu1 }
 0x224   :  { %v665_v40 = vpack.c.bf16 %v465_v39, %v462_v36 }
 0x225   :  { %678 = vst [vmem:[#allocation8 + $0x38] sm:$0xff] %v670_v38  }
 0x226   :  { %677 = vst [vmem:[#allocation8 + $0x30] sm:$0xff] %v665_v40  }
 0x227   :  { %882 = shalt.err (!%p879_p0)
}
 0x228   :  { %s883_s6 = scalar_lea.hbm %s1004_s4, 1024 }
 0x229   :  { %p884_p1 = scmp.ne.s32.totalorder %s1004_s4, %s883_s6  ;;  %p887_p2 = scmp.lt.u32.totalorder %s883_s6, %s1004_s4 }
 0x22b   :  { %p889_p3 = pnand %p887_p2, %p884_p1 }
 0x22d   :  { %892 = shalt.err (!%p889_p3)
}
 0x22e   :  { %568 = dma.vmem_to_hbm [thread:$0]  %s563_s26, 1024, %s1004_s4, [#allocation4], %s901_s27, %s901_s27, %s902_s28  }
 0x22f   :  { %897 = dma.done.wait [#allocation4], 1024  }
 0x230   :  { %898 = vsyncadd [#allocation4], 4294966272 }
 0x231   :  { %572 = vsyncpa [#allocation3], 1 }
 0x232   :  { %573 = vsyncpa [#allocation6], 1 }
 0x233   :  { %574 = vsyncpa [#allocation4], 1 }

</bundles_post_ra>
